<compile_context>
chip_gen: v5e
topology: v5e:2x2
jax: 0.10.0
libtpu: 0.0.40
codegen_flags: <defaults>
</compile_context>

<pallas_src>
import jax
import jax.numpy as jnp
from jax.experimental import pallas as pl
from jax.experimental.pallas import tpu as pltpu


def _add10_kernel(x_ref, o_ref):
    o_ref[...] = x_ref[...] + jnp.asarray(10, dtype=x_ref.dtype)


_LANE = 128
# Minimum sublane count per element size (f32 -> 8, bf16 -> 16, int8/fp8 -> 32).
_MIN_SUBLANES = {4: 8, 2: 16, 1: 32}
# ~2 MiB per block: 2 arrays x 2 pipeline buffers x 2 MiB = 8 MiB, well under the
# 16 MiB scoped-VMEM default on v5e (32 MiB on v6e/v7x), but big enough to sit
# at ~85%+ of HBM roofline and amortize the ~0.35 us per-grid-step overhead.
_TARGET_BLOCK_BYTES = 2 * 1024 * 1024


def add_10_to_elements(x):
    """Elementwise x + 10 via a Pallas TPU kernel. Works for any shape/dtype."""
    orig_shape = x.shape
    dtype = x.dtype
    n = x.size
    if n == 0:
        return x

    itemsize = jnp.dtype(dtype).itemsize
    sub = _MIN_SUBLANES.get(itemsize, 8)

    # Pick the widest lane-dense width (multiple of 128) that divides n: the
    # common case then needs no pad / slice HBM copies and emits wide unmasked
    # vector stores.
    width = None
    for w in (2048, 1024, 512, 256, 128):
        if n % w == 0:
            width = w
            break

    if width is not None:
        rows = n // width
        x2d = jnp.reshape(x, (rows, width))
        padded = False
    else:
        # Ragged element count: fall back to a padded 128-wide slab. The pad and
        # final slice each cost an HBM copy, but only awkward sizes hit this.
        width = _LANE
        pad_to = sub * width
        n_pad = ((n + pad_to - 1) // pad_to) * pad_to
        x_flat = jnp.pad(jnp.ravel(x), (0, n_pad - n))
        rows = n_pad // width
        x2d = jnp.reshape(x_flat, (rows, width))
        padded = True

    # Row tile: target ~_TARGET_BLOCK_BYTES per block, rounded to the dtype's
    # minimum sublane multiple. Ragged final block is handled by the cdiv grid
    # (Pallas masks out-of-bounds rows), so no divisor-shrinking loop.
    block_rows = max(sub, (_TARGET_BLOCK_BYTES // (width * itemsize)) // sub * sub)
    if block_rows >= rows:
        block_rows = rows  # single full-array block (always a legal block shape)
    grid = (pl.cdiv(rows, block_rows),)

    out2d = pl.pallas_call(
        _add10_kernel,
        out_shape=jax.ShapeDtypeStruct((rows, width), dtype),
        grid_spec=pltpu.PrefetchScalarGridSpec(
            num_scalar_prefetch=0,
            grid=grid,
            in_specs=[pl.BlockSpec((block_rows, width), lambda i: (i, 0))],
            out_specs=pl.BlockSpec((block_rows, width), lambda i: (i, 0)),
        ),
        compiler_params=pltpu.CompilerParams(
            dimension_semantics=("parallel",),  # shard grid across v7x's 2 TCs
        ),
    )(x2d)

    if padded:
        return jnp.reshape(jnp.ravel(out2d)[:n], orig_shape)
    return jnp.reshape(out2d, orig_shape)


if __name__ == "__main__":
    key = jax.random.PRNGKey(0)
    # Small NCHW-style tensor: batch=2, channels=4, 16x16 spatial.
    x = jax.random.normal(key, (2, 4, 16, 16), dtype=jnp.float32)

    y = add_10_to_elements(x)
    y = jax.block_until_ready(y)

    expected = x + 10.0
    assert y.shape == x.shape and y.dtype == x.dtype
    assert jnp.allclose(y, expected, atol=1e-6, rtol=1e-6)
    print("KERNEL_OK")
</pallas_src>

<mosaic_0001>
module attributes {stable_mosaic.version = 11 : i64} {
  func.func @_add10_kernel(%arg0: i32, %arg1: memref<1x2048xf32, #tpu.memory_space<vmem>>, %arg2: memref<1x2048xf32, #tpu.memory_space<vmem>>) attributes {dimension_semantics = [#tpu.dimension_semantics<parallel>], iteration_bounds = array<i64: 1>, scalar_prefetch = 0 : i64, scratch_operands = 0 : i64, tpu.core_type = #tpu.core_type<tc>, window_params = [{transform_indices = @transform_0, window_bounds = array<i64: 1, 2048>}, {transform_indices = @transform_1, window_bounds = array<i64: 1, 2048>}]} {
    %c0 = arith.constant 0 : index
    %c0_0 = arith.constant 0 : index
    %0 = vector.load %arg1[%c0, %c0_0] : memref<1x2048xf32, #tpu.memory_space<vmem>>, vector<1x2048xf32>
    %cst = arith.constant 1.000000e+01 : f32
    %1 = vector.broadcast %cst : f32 to vector<1x2048xf32>
    %2 = arith.addf %0, %1 : vector<1x2048xf32>
    %c0_1 = arith.constant 0 : index
    %c0_2 = arith.constant 0 : index
    %3 = vector.load %arg2[%c0_1, %c0_2] : memref<1x2048xf32, #tpu.memory_space<vmem>>, vector<1x2048xf32>
    tpu.vector_store %arg2[%c0_1, %c0_2], %2 {strides = array<i32>} : memref<1x2048xf32, #tpu.memory_space<vmem>>, vector<1x2048xf32>,
    return
  }
  func.func @transform_0(%arg0: i32) -> (i32, i32) {
    %c0_i32 = arith.constant 0 : i32
    %c0_i32_0 = arith.constant 0 : i32
    return %arg0, %c0_i32 : i32, i32
  }
  func.func @transform_1(%arg0: i32) -> (i32, i32) {
    %c0_i32 = arith.constant 0 : i32
    %c0_i32_0 = arith.constant 0 : i32
    return %arg0, %c0_i32 : i32, i32
  }
}

</mosaic_0001>

<bundles_post_ra>
// kernel: tpu_custom_call.1
= control target key start
LH: loop header
LB: loop body
LE: loop exit
PB: predicated region body
PF: predicated region fallthrough
CT: control target
= control target key end

     0   :  { %6 = vsyncpa [#allocation3], 0  ;;  %s118_s0 = inlined_call_operand.hbm [shape: f32[1,2048], index: 0, kind: input, shape index: {}]   ;;  %s119_s1 = inlined_call_operand.hbm [shape: f32[1,2048], index: 1, kind: output, shape index: {}]  }
   0x1   :  { %7 = vsyncpa [#allocation4], 0  ;;  %s13_s8 = sshll.u32 %s118_s0, 4  ;;  %s100_s9 = smov [#allocation2]   ;;  %s14_s8 = int_to_ptr.hbm [resolvable:$true] %s13_s8 }
   0x2   :  { %s15_s10 = sshll.u32 %s100_s9, 4  ;;  %s16_s10 = int_to_ptr.vmem [resolvable:$true] %s15_s10 }
   0x3   :  { %18 = dma.hbm_to_vmem [thread:$0]  %s14_s8, 256, %s16_s10, [#allocation3]  }
   0x4   :  { %96 = dma.done.wait [#allocation3], 256  }
   0x5   :  { %97 = vsyncadd [#allocation3], 4294967040  ;;  %s101_s11 = smov [#allocation5]   ;;  %s36_s15 = sshll.u32 %s119_s1, 4  ;;  %v23_v0 = vld [vmem:[#allocation2] sm:$0xff]  ;;  %v24_v1 = vld [vmem:[#allocation2 + $0x8] sm:$0xff]  ;;  %s37_s15 = int_to_ptr.hbm [resolvable:$true] %s36_s15 }
   0x6   :  { %s34_s12 = sshll.u32 %s101_s11, 4  ;;  %v25_v2 = vadd.f32 10.0, %v23_v0  ;;  %v26_v3 = vadd.f32 10.0, %v24_v1  ;;  %s35_s12 = int_to_ptr.vmem [resolvable:$true] %s34_s12 }
   0x8   :  { %27 = vst [vmem:[#allocation5] sm:$0xff] %v25_v2 }
   0x9   :  { %28 = vst [vmem:[#allocation5 + $0x8] sm:$0xff] %v26_v3 }
   0xa   :  { %39 = dma.vmem_to_hbm [thread:$0]  %s35_s12, 256, %s37_s15, [#allocation4]  }
   0xb   :  { %98 = dma.done.wait [#allocation4], 256  }
   0xc   :  { %99 = vsyncadd [#allocation4], 4294967040 }
   0xd   :  { %44 = vsyncpa [#allocation3], 1 }
   0xe   :  { %45 = vsyncpa [#allocation4], 1 }

</bundles_post_ra>
